<compile_context>
chip_gen: v7x
topology: tpu7x:2x2x1
jax: 0.10.0
libtpu: 0.0.40
codegen_flags: <defaults>
</compile_context>

<pallas_src>
import functools

import jax
import jax.numpy as jnp
from jax import lax
from jax.experimental import pallas as pl
from jax.experimental.pallas import tpu as pltpu


# ----------------------------------------------------------------------------
# Pallas kernel (fused: BN1 -> ReLU -> conv1(1x1) -> BN2 -> ReLU -> conv2(1x1))
# ----------------------------------------------------------------------------
def _confidence_kernel(x_ref, bn1_ref, w1_ref, t2_ref, w2_ref, o_ref):
    """Channels on sublanes, pixels on lanes (one batch image per grid row).

    x_ref  : (Cin,  TP)   f32  input pixel tile
    bn1_ref: (Cin,  2)    f32  folded BN1 [scale | shift]
    w1_ref : (Cmid, Cin)  bf16 conv1 weight with BN2 scale folded into rows
    t2_ref : (Cmid, 1)    f32  folded BN2 shift
    w2_ref : (Ncls, Cmid) bf16 conv2 weight
    o_ref  : (Ncls, TP)   f32  output pixel tile
    """
    s1 = bn1_ref[:, 0:1]
    t1 = bn1_ref[:, 1:2]
    # BN1 + ReLU on the VPU (f32), then cast to bf16 for a single MXU pass.
    h = jnp.maximum(x_ref[...] * s1 + t1, 0.0).astype(jnp.bfloat16)
    # conv1 (1x1) with BN2 scale pre-folded; f32 accumulation on the MXU.
    h1 = jnp.dot(w1_ref[...], h, preferred_element_type=jnp.float32)
    # BN2 shift + ReLU, cast back to bf16.
    h1 = jnp.maximum(h1 + t2_ref[...], 0.0).astype(jnp.bfloat16)
    # conv2 (1x1), no bias.
    o_ref[...] = jnp.dot(w2_ref[...], h1, preferred_element_type=jnp.float32)


# ----------------------------------------------------------------------------
# Tile selection helpers (static Python arithmetic on shapes)
# ----------------------------------------------------------------------------
def _round_up(x, m):
    return -(-x // m) * m


def _vmem_bytes(tp, cin, cmid, ncls):
    # streamed input/output tiles, double-buffered, f32
    stream = tp * 4 * 2 * (cin + ncls)
    # in-kernel intermediates: h (bf16), h1 (f32 + bf16)
    interm = tp * (cin * 2 + cmid * 6)
    # resident operands (conservatively counted double-buffered)
    resident = 2 * (cmid * cin * 2 + ncls * cmid * 2 + cin * 2 * 4 + cmid * 4)
    return stream + interm + resident


def _choose_pixel_tile(hw, requested, cin, cmid, ncls, budget):
    tp = max(128, (requested // 128) * 128)
    hw128 = _round_up(hw, 128)
    tp = min(tp, hw128)
    # cap by VMEM budget (v7x has only 64 MiB physical VMEM per TensorCore)
    while tp > 128 and _vmem_bytes(tp, cin, cmid, ncls) > budget:
        tp -= 128
    # prefer a 128-multiple tile that divides the lane-padded pixel count
    # (less zero padding), as long as it stays within 2x of the capped tile.
    for cand in range(tp, 127, -128):
        if hw128 % cand == 0:
            if cand * 2 >= tp:
                tp = cand
            break
    return tp


# ----------------------------------------------------------------------------
# Wrapper
# ----------------------------------------------------------------------------
@functools.partial(jax.jit, static_argnames=("pixel_tile",))
def confidence_block_forward(x_nchw, params, *, pixel_tile=1024):
    """Pallas implementation of ConfidenceBlock.forward (eval mode).

    x_nchw: (N, inplanes, H, W) float32, NCHW (PyTorch convention).
    Returns (N, nclasses, H, W) float32.
    """
    N, Cin, H, W = x_nchw.shape
    HW = H * W
    Cmid = params["w1s"].shape[0]
    Ncls = params["w2"].shape[0]

    tp = _choose_pixel_tile(HW, pixel_tile, Cin, Cmid, Ncls,
                            budget=24 * 1024 * 1024)
    HWp = _round_up(HW, tp)

    # Free reshape (NCHW is contiguous): (N, Cin, H, W) -> (N, Cin, HW).
    x3 = x_nchw.reshape(N, Cin, HW)
    if HWp != HW:
        # Pad pixel dim with zeros so every block is a full lane-dense tile
        # (padded output columns are sliced off below).
        x3 = jnp.pad(x3, ((0, 0), (0, 0), (0, HWp - HW)))

    grid = (N, HWp // tp)

    def resident(shape):
        # grid-invariant operands: constant index_map -> DMA'd once,
        # stay VMEM-resident across the whole grid.
        return pl.BlockSpec(shape, lambda n, p: (0,) * len(shape))

    flops = 2 * N * HWp * (Cmid * Cin + Ncls * Cmid)
    bytes_accessed = (N * HWp * (Cin + Ncls) * 4
                      + Cmid * Cin * 2 + Ncls * Cmid * 2
                      + Cin * 2 * 4 + Cmid * 4)

    out3 = pl.pallas_call(
        _confidence_kernel,
        out_shape=jax.ShapeDtypeStruct((N, Ncls, HWp), jnp.float32),
        grid=grid,
        in_specs=[
            # streamed pixel tiles; leading batch dim squeezed out
            pl.BlockSpec((None, Cin, tp), lambda n, p: (n, 0, p)),
            resident((Cin, 2)),      # BN1 [scale | shift]
            resident((Cmid, Cin)),   # conv1 weight (BN2 scale folded in)
            resident((Cmid, 1)),     # BN2 shift
            resident((Ncls, Cmid)),  # conv2 weight
        ],
        out_specs=pl.BlockSpec((None, Ncls, tp), lambda n, p: (n, 0, p)),
        compiler_params=pltpu.CompilerParams(
            dimension_semantics=("parallel", "parallel"),
            vmem_limit_bytes=32 * 1024 * 1024),
        cost_estimate=pl.CostEstimate(
            flops=flops, transcendentals=0, bytes_accessed=bytes_accessed),
    )(x3, params["bn1"], params["w1s"], params["t2"], params["w2"])

    if HWp != HW:
        out3 = out3[:, :, :HW]
    return out3.reshape(N, Ncls, H, W)


# ----------------------------------------------------------------------------
# Parameter construction (deterministic, synthetic)
# ----------------------------------------------------------------------------
def make_params(key, inplanes, channels, nclasses, eps=1e-5):
    ks = jax.random.split(key, 4)
    conv1_w = jax.random.normal(ks[0], (channels, inplanes), jnp.float32) \
        / jnp.sqrt(inplanes)
    conv2_w = jax.random.normal(ks[1], (nclasses, channels), jnp.float32) \
        / jnp.sqrt(channels)

    def bn(k, c):
        k1, k2, k3, k4 = jax.random.split(k, 4)
        gamma = 1.0 + 0.1 * jax.random.normal(k1, (c,), jnp.float32)
        beta = 0.1 * jax.random.normal(k2, (c,), jnp.float32)
        mean = 0.1 * jax.random.normal(k3, (c,), jnp.float32)
        var = jax.random.uniform(k4, (c,), jnp.float32, 0.5, 1.5)
        return gamma, beta, mean, var

    g1, b1, m1, v1 = bn(ks[2], inplanes)
    g2, b2, m2, v2 = bn(ks[3], channels)
    s1 = g1 / jnp.sqrt(v1 + eps)
    t1 = b1 - m1 * s1
    s2 = g2 / jnp.sqrt(v2 + eps)
    t2 = b2 - m2 * s2

    params = {
        "bn1": jnp.stack([s1, t1], axis=1),                     # (Cin, 2)
        # BN2 scale folded into conv1 output rows (conv1 has no bias).
        "w1s": (conv1_w * s2[:, None]).astype(jnp.bfloat16),    # (Cmid, Cin)
        "t2": t2.reshape(channels, 1),                          # (Cmid, 1)
        "w2": conv2_w.astype(jnp.bfloat16),                     # (Ncls, Cmid)
    }
    raw = {"conv1_w": conv1_w, "conv2_w": conv2_w,
           "s1": s1, "t1": t1, "s2": s2, "t2": t2}
    return params, raw


# ----------------------------------------------------------------------------
# Pure-JAX reference (NCHW, matches PyTorch eval-mode semantics, f32 HIGHEST)
# ----------------------------------------------------------------------------
def ref_forward(x, raw):
    dn = ("NCHW", "OIHW", "NCHW")
    hp = lax.Precision.HIGHEST

    def bn(y, s, t):
        return y * s[None, :, None, None] + t[None, :, None, None]

    y = jnp.maximum(bn(x, raw["s1"], raw["t1"]), 0.0)
    y = lax.conv_general_dilated(y, raw["conv1_w"][:, :, None, None], (1, 1),
                                 "VALID", dimension_numbers=dn, precision=hp)
    y = jnp.maximum(bn(y, raw["s2"], raw["t2"]), 0.0)
    y = lax.conv_general_dilated(y, raw["conv2_w"][:, :, None, None], (1, 1),
                                 "VALID", dimension_numbers=dn, precision=hp)
    return y


# ----------------------------------------------------------------------------
def _check(out, ref, tag):
    # Kernel uses single-pass bf16 MXU matmuls (f32 accumulation); reference is
    # f32 HIGHEST, so compare with a bf16-appropriate tolerance.
    err = float(jnp.max(jnp.abs(out - ref)) / (jnp.max(jnp.abs(ref)) + 1e-6))
    if err > 5e-2:
        raise AssertionError(f"{tag} mismatch: normalized max abs err = {err}")


if __name__ == "__main__":
    INPLANES = 32       # small synthetic sizes (PyTorch defaults: 1024/1024/6)
    CHANNELS = 64
    NCLASSES = 6
    N, H, W = 2, 16, 16

    key = jax.random.PRNGKey(0)
    kx, kp, kx2 = jax.random.split(key, 3)
    params, raw = make_params(kp, INPLANES, CHANNELS, NCLASSES)

    # Main case: H*W already a multiple of 128.
    x = jax.random.normal(kx, (N, INPLANES, H, W), jnp.float32)
    out = jax.block_until_ready(confidence_block_forward(x, params))
    assert out.shape == (N, NCLASSES, H, W), out.shape
    _check(out, jax.block_until_ready(ref_forward(x, raw)), "main")

    # Ragged case: exercises the pixel-padding path (H*W not a 128 multiple).
    x2 = jax.random.normal(kx2, (N, INPLANES, 10, 10), jnp.float32)
    out2 = jax.block_until_ready(confidence_block_forward(x2, params))
    assert out2.shape == (N, NCLASSES, 10, 10), out2.shape
    _check(out2, jax.block_until_ready(ref_forward(x2, raw)), "ragged")

    print("KERNEL_OK")
</pallas_src>

<mosaic_0001>
module attributes {stable_mosaic.version = 11 : i64} {
  func.func @_confidence_kernel(%arg0: i32, %arg1: i32, %arg2: memref<1x32x256xf32, #tpu.memory_space<vmem>>, %arg3: memref<32x2xf32, #tpu.memory_space<vmem>>, %arg4: memref<64x32xbf16, #tpu.memory_space<vmem>>, %arg5: memref<64x1xf32, #tpu.memory_space<vmem>>, %arg6: memref<6x64xbf16, #tpu.memory_space<vmem>>, %arg7: memref<1x6x256xf32, #tpu.memory_space<vmem>>) attributes {dimension_semantics = [#tpu.dimension_semantics<parallel>, #tpu.dimension_semantics<parallel>], iteration_bounds = array<i64: 2, 1>, scalar_prefetch = 0 : i64, scratch_operands = 0 : i64, tpu.core_type = #tpu.core_type<tc>, window_params = [{transform_indices = @transform_0, window_bounds = array<i64: 1, 32, 256>}, {pipeline_mode = #tpu.pipeline_mode<synchronous>, transform_indices = @transform_1, window_bounds = array<i64: 32, 2>}, {pipeline_mode = #tpu.pipeline_mode<synchronous>, transform_indices = @transform_2, window_bounds = array<i64: 64, 32>}, {pipeline_mode = #tpu.pipeline_mode<synchronous>, transform_indices = @transform_3, window_bounds = array<i64: 64, 1>}, {pipeline_mode = #tpu.pipeline_mode<synchronous>, transform_indices = @transform_4, window_bounds = array<i64: 6, 64>}, {transform_indices = @transform_5, window_bounds = array<i64: 1, 6, 256>}]} {
    %c0 = arith.constant 0 : index
    %c0_0 = arith.constant 0 : index
    %0 = vector.load %arg3[%c0, %c0_0] : memref<32x2xf32, #tpu.memory_space<vmem>>, vector<32x1xf32>
    %c0_1 = arith.constant 0 : index
    %c1 = arith.constant 1 : index
    %1 = vector.load %arg3[%c0_1, %c1] : memref<32x2xf32, #tpu.memory_space<vmem>>, vector<32x1xf32>
    %c0_2 = arith.constant 0 : index
    %c0_3 = arith.constant 0 : index
    %c0_4 = arith.constant 0 : index
    %2 = vector.load %arg2[%c0_2, %c0_3, %c0_4] : memref<1x32x256xf32, #tpu.memory_space<vmem>>, vector<1x32x256xf32>
    %3 = vector.shape_cast %2 : vector<1x32x256xf32> to vector<32x256xf32>
    %4 = vector.broadcast %0 : vector<32x1xf32> to vector<32x256xf32>
    %5 = arith.mulf %3, %4 : vector<32x256xf32>
    %6 = vector.broadcast %1 : vector<32x1xf32> to vector<32x256xf32>
    %7 = arith.addf %5, %6 : vector<32x256xf32>
    %cst = arith.constant 0.000000e+00 : f32
    %8 = vector.broadcast %cst : f32 to vector<32x256xf32>
    %9 = arith.maximumf %7, %8 : vector<32x256xf32>
    %10 = arith.truncf %9 : vector<32x256xf32> to vector<32x256xbf16>
    %c0_5 = arith.constant 0 : index
    %c0_6 = arith.constant 0 : index
    %11 = vector.load %arg4[%c0_5, %c0_6] : memref<64x32xbf16, #tpu.memory_space<vmem>>, vector<64x32xbf16>
    %cst_7 = arith.constant dense<0.000000e+00> : vector<64x256xf32>
    %12 = tpu.matmul %11, %10, %cst_7 {dimension_numbers = #tpu.dot_dimension_numbers<[1], [0], [0], [1], [0, 0, 1, 1], [], []>} : vector<64x32xbf16>, vector<32x256xbf16>, vector<64x256xf32> -> vector<64x256xf32>
    %c0_8 = arith.constant 0 : index
    %c0_9 = arith.constant 0 : index
    %13 = vector.load %arg5[%c0_8, %c0_9] : memref<64x1xf32, #tpu.memory_space<vmem>>, vector<64x1xf32>
    %14 = vector.broadcast %13 : vector<64x1xf32> to vector<64x256xf32>
    %15 = arith.addf %12, %14 : vector<64x256xf32>
    %cst_10 = arith.constant 0.000000e+00 : f32
    %16 = vector.broadcast %cst_10 : f32 to vector<64x256xf32>
    %17 = arith.maximumf %15, %16 : vector<64x256xf32>
    %18 = arith.truncf %17 : vector<64x256xf32> to vector<64x256xbf16>
    %c0_11 = arith.constant 0 : index
    %c0_12 = arith.constant 0 : index
    %19 = vector.load %arg6[%c0_11, %c0_12] : memref<6x64xbf16, #tpu.memory_space<vmem>>, vector<6x64xbf16>
    %cst_13 = arith.constant dense<0.000000e+00> : vector<6x256xf32>
    %20 = tpu.matmul %19, %18, %cst_13 {dimension_numbers = #tpu.dot_dimension_numbers<[1], [0], [0], [1], [0, 0, 1, 1], [], []>} : vector<6x64xbf16>, vector<64x256xbf16>, vector<6x256xf32> -> vector<6x256xf32>
    %c0_14 = arith.constant 0 : index
    %c0_15 = arith.constant 0 : index
    %c0_16 = arith.constant 0 : index
    %21 = vector.load %arg7[%c0_14, %c0_15, %c0_16] : memref<1x6x256xf32, #tpu.memory_space<vmem>>, vector<1x6x256xf32>
    %22 = vector.shape_cast %21 : vector<1x6x256xf32> to vector<6x256xf32>
    %23 = vector.shape_cast %20 : vector<6x256xf32> to vector<1x6x256xf32>
    tpu.vector_store %arg7[%c0_14, %c0_15, %c0_16], %23 {strides = array<i32>} : memref<1x6x256xf32, #tpu.memory_space<vmem>>, vector<1x6x256xf32>,
    return
  }
  func.func @transform_0(%arg0: i32, %arg1: i32) -> (i32, i32, i32) {
    %c0_i32 = arith.constant 0 : i32
    %c0_i32_0 = arith.constant 0 : i32
    return %arg0, %c0_i32, %arg1 : i32, i32, i32
  }
  func.func @transform_1(%arg0: i32, %arg1: i32) -> (i32, i32) {
    %c0_i32 = arith.constant 0 : i32
    %c0_i32_0 = arith.constant 0 : i32
    %c0_i32_1 = arith.constant 0 : i32
    return %c0_i32, %c0_i32_0 : i32, i32
  }
  func.func @transform_2(%arg0: i32, %arg1: i32) -> (i32, i32) {
    %c0_i32 = arith.constant 0 : i32
    %c0_i32_0 = arith.constant 0 : i32
    %c0_i32_1 = arith.constant 0 : i32
    return %c0_i32, %c0_i32_0 : i32, i32
  }
  func.func @transform_3(%arg0: i32, %arg1: i32) -> (i32, i32) {
    %c0_i32 = arith.constant 0 : i32
    %c0_i32_0 = arith.constant 0 : i32
    %c0_i32_1 = arith.constant 0 : i32
    return %c0_i32, %c0_i32_0 : i32, i32
  }
  func.func @transform_4(%arg0: i32, %arg1: i32) -> (i32, i32) {
    %c0_i32 = arith.constant 0 : i32
    %c0_i32_0 = arith.constant 0 : i32
    %c0_i32_1 = arith.constant 0 : i32
    return %c0_i32, %c0_i32_0 : i32, i32
  }
  func.func @transform_5(%arg0: i32, %arg1: i32) -> (i32, i32, i32) {
    %c0_i32 = arith.constant 0 : i32
    %c0_i32_0 = arith.constant 0 : i32
    return %arg0, %c0_i32, %arg1 : i32, i32, i32
  }
}

</mosaic_0001>

<bundles_post_ra>
// kernel: confidence_block_forward.1
= control target key start
LH: loop header
LB: loop body
LE: loop exit
PB: predicated region body
PF: predicated region fallthrough
CT: control target
= control target key end

     0   :  { %s777_s18 = smov 0   ;;  %s779_s19 = smov 0   ;;  %s878_s0 = inlined_call_operand.vmem [shape: f32[2,32,256], index: 0, kind: input, shape index: {}]   ;;  %s879_s1 = inlined_call_operand.vmem [shape: f32[32,2], index: 1, kind: input, shape index: {}]   ;;  %s880_s2 = inlined_call_operand.vmem [shape: bf16[64,32], index: 2, kind: input, shape index: {}]   ;;  %s881_s3 = inlined_call_operand.vmem [shape: f32[64,1], index: 3, kind: input, shape index: {}]   ;;  %s882_s4 = inlined_call_operand.vmem [shape: bf16[6,64], index: 4, kind: input, shape index: {}]   ;;  %s883_s5 = inlined_call_operand.vmem [shape: f32[2,6,256], index: 5, kind: output, shape index: {}]  }
   0x1   :  { %s781_s20 = smov 0  }
   0x2 LB: > { %s27_s21 = sadd.s32 1, %s739_s19  ;;  %p666_p0 = scmp.ge.s32.totalorder %s743_s20, 1  ;;  %s743_s20 = sphi %s781_s20, %s15_s20   ;;  %s739_s19 = sphi %s779_s19, %s885_s19   ;;  %s735_s18 = sphi %s777_s18, %s884_s18  }
   0x3   : > { %p29_p1 = scmp.ge.s32.totalorder %s27_s21, 2  ;;  %p208_p2 = scmp.lt.s32.totalorder %s743_s20, 3 }
   0x5   : > { %s887_s21 = smov (%p29_p1, %s27_s21), 0  ;;  %p209_p3 = pnand %p666_p0, %p208_p2 }
   0x6   : > { %v265_v0 = vld [vmem:[%s879_s1] sm:$0xff] (!%p209_p3)  ;;  %v745_v1 = vmov (!%p209_p3), 1   ;;  %v746_v2 = vmov (!%p209_p3), 0   ;;  %v266_v3 = vld [vmem:[%s879_s1 + $0x8] sm:$0xff] (!%p209_p3)  ;;  %v267_v4 = vld [vmem:[%s879_s1 + $0x10] sm:$0xff] (!%p209_p3)  ;;  %p245_p4 = scmp.lt.s32.totalorder (!%p209_p3), %s735_s18, 1 }
   0x7   : > { %212 = sbr.rel (%p209_p3) target bundleno = 624 (0x270), region = 40  ;;  %711 = vset.pattern.permute.xlu1 (!%p209_p3), %v745_v1  ;;  %710 = vset.pattern.permute.xlu0 (!%p209_p3), %v746_v2  ;;  %v268_v5 = vld [vmem:[%s879_s1 + $0x18] sm:$0xff] (!%p209_p3)  ;;  %v349_v6 = vld [vmem:[%s881_s3] sm:$0xff] (!%p209_p3)  ;;  %v350_v7 = vld [vmem:[%s881_s3 + $0x8] sm:$0xff] (!%p209_p3)  ;;  %vm417_vm0 = vcmask (!%p209_p3), 261120   ;;  %vm528_vm1 = vcmask (!%p209_p3), 523264  }
   0x8   : > { %306 = vperm.xlu1 (!%p209_p3), %711, %v265_v0   ;;  %279 = vperm.xlu0 (!%p209_p3), %710, %v265_v0   ;;  %v351_v8 = vld [vmem:[%s881_s3 + $0x10] sm:$0xff] (!%p209_p3)  ;;  %v353_v9 = vld [vmem:[%s881_s3 + $0x20] sm:$0xff] (!%p209_p3)  ;;  %v352_v10 = vld [vmem:[%s881_s3 + $0x18] sm:$0xff] (!%p209_p3) }
   0x9   : > { %462 = vmatprep.mubr.bf16.mxu0 (!%p209_p3), %v746_v2  ;;  %564 = vmatprep.mubr.bf16.mxu1 (!%p209_p3), %v746_v2  ;;  %v355_v11 = vld [vmem:[%s881_s3 + $0x30] sm:$0xff] (!%p209_p3)  ;;  %v354_v12 = vld [vmem:[%s881_s3 + $0x28] sm:$0xff] (!%p209_p3)  ;;  %v356_v13 = vld [vmem:[%s881_s3 + $0x38] sm:$0xff] (!%p209_p3) }
   0xa   : > { %v717_v58 = vld [vmem:[%s880_s2] sm:$0xff] (!%p209_p3)   ;;  %v718_v59 = vld [vmem:[%s880_s2 + $0x8] sm:$0xff] (!%p209_p3)   ;;  %v719_v60 = vld [vmem:[%s880_s2 + $0x10] sm:$0xff] (!%p209_p3)  }
   0xb   : > { %v720_v61 = vld [vmem:[%s880_s2 + $0x18] sm:$0xff] (!%p209_p3)  }
   0xc   : > { %310 = vperm.xlu1 (!%p209_p3), %711, %v266_v3   ;;  %284 = vperm.xlu0 (!%p209_p3), %710, %v266_v3  }
   0xe   : > { %s889_s18 = smov (!%p245_p4, %s735_s18), 1 }
   0xf   : > { %s682_s25 = sshll.u32 %s889_s18, 6  ;;  %s683_s14 = sshll.u32 %s889_s18, 4 }
  0x10   : > { %712 = vset.pattern.permute.xlu1 %v746_v2  ;;  %289 = vperm.xlu0 %710, %v267_v4   ;;  %s252_s28 = scalar_lea.vmem %s878_s0, %s682_s25  ;;  %s262_s17 = scalar_lea.vmem %s883_s5, %s683_s14 }
  0x11   : > { %294 = vperm.xlu1 %712, %v268_v5   ;;  %v269_v14 = vld [vmem:[%s252_s28] sm:$0xff]  ;;  %v270_v15 = vld [vmem:[%s252_s28 + $0x8] sm:$0xff]  ;;  %v271_v20 = vld [vmem:[%s252_s28 + $0x10] sm:$0xff] }
  0x12   : > { %v272_v21 = vld [vmem:[%s252_s28 + $0x18] sm:$0xff]  ;;  %v273_v31 = vld [vmem:[%s252_s28 + $0x20] sm:$0xff]  ;;  %v274_v32 = vld [vmem:[%s252_s28 + $0x28] sm:$0xff] }
  0x13   : > { %v275_v38 = vld [vmem:[%s252_s28 + $0x30] sm:$0xff]  ;;  %v276_v39 = vld [vmem:[%s252_s28 + $0x38] sm:$0xff] }
  0x14   : > { %713 = vset.pattern.permute.xlu0 %v745_v1 }
  0x15   : > { %714 = vset.pattern.permute.xlu1 %v745_v1  ;;  %314 = vperm.xlu0 %713, %v267_v4  }
  0x16   : > { %318 = vperm.xlu1 %714, %v268_v5  }
  0x19   : > { %716 = vset.pattern.permute.xlu0 %v746_v2 }
  0x1a   : > { %715 = vset.pattern.permute.xlu1 %v746_v2  ;;  %364 = vperm.xlu0 %716, %v350_v7  }
  0x1b   : > { %359 = vperm.xlu1 %715, %v349_v6  }
  0x1e   : > { %379 = vperm.xlu0 %716, %v353_v9  }
  0x1f   : > { %369 = vperm.xlu1 %715, %v351_v8  }
  0x22   : > { %389 = vperm.xlu0 %716, %v355_v11  }
  0x23   : > { %374 = vperm.xlu1 %715, %v352_v10  }
  0x27   : > { %384 = vperm.xlu1 %715, %v354_v12  }
  0x2b   : > { %394 = vperm.xlu1 %715, %v356_v13  }
  0x87   : > { %v307_v16 = vpop.permute.xlu1 %306  ;;  %v280_v17 = vpop.permute.xlu0 %279 }
  0x88   : > { %v297_v18 = vmul.f32 %v280_v17, %v269_v14  ;;  %v298_v19 = vmul.f32 %v280_v17, %v270_v15 }
  0x8a   : > { %v321_v24 = vadd.f32 %v307_v16, %v297_v18  ;;  %v322_v27 = vadd.f32 %v307_v16, %v298_v19 }
  0x8b   : > { %v311_v22 = vpop.permute.xlu1 %310  ;;  %v285_v23 = vpop.permute.xlu0 %284 }
  0x8c   : > { %v299_v25 = vmul.f32 %v285_v23, %v271_v20  ;;  %v300_v26 = vmul.f32 %v285_v23, %v272_v21  ;;  %v330_v34 = vmax.f32 %v322_v27, 0.0  ;;  %v329_v36 = vmax.f32 %v321_v24, 0.0 }
  0x8e   : > { %v323_v28 = vadd.f32 %v311_v22, %v299_v25  ;;  %v324_v29 = vadd.f32 %v311_v22, %v300_v26 }
  0x8f   : > { %v290_v30 = vpop.permute.xlu0 %289 }
  0x90   : > { %v295_v33 = vpop.permute.xlu1 %294  ;;  %v332_v35 = vmax.f32 %v324_v29, 0.0  ;;  %v331_v37 = vmax.f32 %v323_v28, 0.0  ;;  %v301_v42 = vmul.f32 %v290_v30, %v273_v31  ;;  %v302_v43 = vmul.f32 %v290_v30, %v274_v32 }
  0x91   : > { %v303_v44 = vmul.f32 %v295_v33, %v275_v38  ;;  %v304_v45 = vmul.f32 %v295_v33, %v276_v39 }
  0x92   : > { %v338_v40 = vpack.c.bf16 %v332_v35, %v330_v34  ;;  %v337_v41 = vpack.c.bf16 %v331_v37, %v329_v36 }
  0x94   : > { %v315_v46 = vpop.permute.xlu0 %314  ;;  %430 = vmatprep.subr.bf16.mxu0 %v338_v40 }
  0x95   : > { %v325_v47 = vadd.f32 %v315_v46, %v301_v42  ;;  %v326_v48 = vadd.f32 %v315_v46, %v302_v43  ;;  %v319_v49 = vpop.permute.xlu1 %318  ;;  %431 = vmatpush1.bf16.msra.mxu0 %v337_v41 }
  0x96   : > { %v327_v50 = vadd.f32 %v319_v49, %v303_v44  ;;  %v328_v51 = vadd.f32 %v319_v49, %v304_v45 }
  0x97   : > { %v333_v52 = vmax.f32 %v325_v47, 0.0  ;;  %v334_v53 = vmax.f32 %v326_v48, 0.0 }
  0x98   : > { %v335_v54 = vmax.f32 %v327_v50, 0.0  ;;  %v336_v55 = vmax.f32 %v328_v51, 0.0 }
  0x99   : > { %v365_v0 = vpop.permute.xlu0 %364 }
  0x9a   : > { %v340_v56 = vpack.c.bf16 %v336_v55, %v334_v53  ;;  %v339_v57 = vpack.c.bf16 %v335_v54, %v333_v52  ;;  %v360_v62 = vpop.permute.xlu1 %359 }
  0x9c   : > { %432 = vmatprep.subr.bf16.mxu0 %v340_v56 }
  0x9d   : > { %433 = vmatpush1.bf16.msra.mxu0 %v339_v57  ;;  %v380_v29 = vpop.permute.xlu0 %379 }
  0x9e   : > { %v370_v8 = vpop.permute.xlu1 %369 }
  0xa0   : > { %675 = vmatmul.mubr.msk.bf16.vlgmr.msra.gmra.mrb[0].mxu0 %vm417_vm0, %v717_v58 }
  0xa1   : > { %472 = vmatprep.mubr.bf16.mxu0 %v746_v2  ;;  %v390_v45 = vpop.permute.xlu0 %389 }
  0xa2   : > { %v375_v18 = vpop.permute.xlu1 %374 }
  0xa6   : > { %v385_v34 = vpop.permute.xlu1 %384 }
  0xa8   : > { %676 = vmatmul.mubr.msk.bf16.gmra.mrb[4].mxu0 %vm417_vm0, %v718_v59 }
  0xa9   : > { %482 = vmatprep.mubr.bf16.mxu0 %v746_v2 }
  0xaa   : > { %v395_v50 = vpop.permute.xlu1 %394 }
  0xb0   : > { %677 = vmatmul.mubr.msk.bf16.gmra.mrb[8].mxu0 %vm417_vm0, %v719_v60 }
  0xb1   : > { %492 = vmatprep.mubr.bf16.mxu0 %v746_v2 }
  0xb8   : > { %678 = vmatmul.mubr.msk.bf16.gmra.mrb[12].mxu0 %vm417_vm0, %v720_v61 }
 0x173   : > { %v464_v63 = vpop.f32.mrb[0].mxu0 }
 0x174   : > { %v465_v1 = vadd.f32 %v464_v63, %v360_v62  ;;  %v466_v3 = vpop.f32.mrb[1].mxu0 }
 0x175   : > { %v467_v4 = vadd.f32 %v466_v3, %v360_v62  ;;  %v468_v5 = vpop.f32.mrb[2].mxu0  ;;  %v527_v62 = vld [vmem:[%s882_s4] sm:$0x7] }
 0x176   : > { %v469_v6 = vadd.f32 %v468_v5, %v365_v0  ;;  %v470_v7 = vpop.f32.mrb[3].mxu0  ;;  %v503_v10 = vmax.f32 %v465_v1, 0.0 }
 0x177   : > { %v471_v9 = vadd.f32 %v470_v7, %v365_v0  ;;  %v504_v12 = vmax.f32 %v467_v4, 0.0 }
 0x178   : > { %v505_v11 = vmax.f32 %v469_v6, 0.0 }
 0x179   : > { %v506_v2 = vmax.f32 %v471_v9, 0.0 }
 0x17a   : > { %v519_v13 = vpack.c.bf16 %v505_v11, %v503_v10 }
 0x17b   : > { %v474_v14 = vpop.f32.mrb[4].mxu0  ;;  %v520_v15 = vpack.c.bf16 %v506_v2, %v504_v12 }
 0x17c   : > { %v475_v16 = vadd.f32 %v474_v14, %v370_v8  ;;  %v476_v17 = vpop.f32.mrb[5].mxu0 }
 0x17d   : > { %v477_v19 = vadd.f32 %v476_v17, %v370_v8  ;;  %v478_v20 = vpop.f32.mrb[6].mxu0  ;;  %532 = vmatprep.subr.bf16.mxu1 %v520_v15 }
 0x17e   : > { %v479_v21 = vadd.f32 %v478_v20, %v375_v18  ;;  %v480_v22 = vpop.f32.mrb[7].mxu0  ;;  %533 = vmatpush1.bf16.msra.mxu1 %v519_v13  ;;  %v507_v24 = vmax.f32 %v475_v16, 0.0 }
 0x17f   : > { %v481_v23 = vadd.f32 %v480_v22, %v375_v18  ;;  %v508_v26 = vmax.f32 %v477_v19, 0.0 }
 0x180   : > { %v509_v25 = vmax.f32 %v479_v21, 0.0 }
 0x181   : > { %v510_v27 = vmax.f32 %v481_v23, 0.0 }
 0x182   : > { %v521_v28 = vpack.c.bf16 %v509_v25, %v507_v24 }
 0x183   : > { %v522_v30 = vpack.c.bf16 %v510_v27, %v508_v26  ;;  %v484_v31 = vpop.f32.mrb[8].mxu0 }
 0x184   : > { %v485_v32 = vadd.f32 %v484_v31, %v380_v29  ;;  %v486_v33 = vpop.f32.mrb[9].mxu0 }
 0x185   : > { %v487_v35 = vadd.f32 %v486_v33, %v380_v29  ;;  %v488_v36 = vpop.f32.mrb[10].mxu0  ;;  %534 = vmatprep.subr.bf16.mxu1 %v522_v30 }
 0x186   : > { %v489_v37 = vadd.f32 %v488_v36, %v385_v34  ;;  %v490_v38 = vpop.f32.mrb[11].mxu0  ;;  %535 = vmatpush1.bf16.msra.mxu1 %v521_v28  ;;  %v511_v40 = vmax.f32 %v485_v32, 0.0 }
 0x187   : > { %v491_v39 = vadd.f32 %v490_v38, %v385_v34  ;;  %v512_v42 = vmax.f32 %v487_v35, 0.0 }
 0x188   : > { %v513_v41 = vmax.f32 %v489_v37, 0.0 }
 0x189   : > { %v514_v43 = vmax.f32 %v491_v39, 0.0 }
 0x18a   : > { %v523_v44 = vpack.c.bf16 %v513_v41, %v511_v40 }
 0x18b   : > { %v524_v46 = vpack.c.bf16 %v514_v43, %v512_v42  ;;  %v494_v47 = vpop.f32.mrb[12].mxu0 }
 0x18c   : > { %v495_v48 = vadd.f32 %v494_v47, %v390_v45  ;;  %v496_v49 = vpop.f32.mrb[13].mxu0 }
 0x18d   : > { %v497_v51 = vadd.f32 %v496_v49, %v390_v45  ;;  %v498_v52 = vpop.f32.mrb[14].mxu0  ;;  %536 = vmatprep.subr.bf16.mxu1 %v524_v46 }
 0x18e   : > { %v499_v53 = vadd.f32 %v498_v52, %v395_v50  ;;  %v500_v54 = vpop.f32.mrb[15].mxu0  ;;  %537 = vmatpush1.bf16.msra.mxu1 %v523_v44  ;;  %v515_v56 = vmax.f32 %v495_v48, 0.0 }
 0x18f   : > { %v501_v55 = vadd.f32 %v500_v54, %v395_v50  ;;  %v516_v58 = vmax.f32 %v497_v51, 0.0 }
 0x190   : > { %v517_v57 = vmax.f32 %v499_v53, 0.0 }
 0x191   : > { %v518_v59 = vmax.f32 %v501_v55, 0.0 }
 0x192   : > { %v525_v60 = vpack.c.bf16 %v517_v57, %v515_v56 }
 0x193   : > { %v526_v61 = vpack.c.bf16 %v518_v59, %v516_v58 }
 0x195   : > { %538 = vmatprep.subr.bf16.mxu1 %v526_v61 }
 0x196   : > { %539 = vmatpush1.bf16.msra.mxu1 %v525_v60 }
 0x199   : > { %679 = vmatmul.mubr.msk.bf16.vlgmr.msra.gmra.mrb[0].mxu1 %vm528_vm1, %v527_v62 }
 0x26c   : > { %v566_v63 = vpop.f32.mrb[0].mxu1 }
 0x26d   : > { %573 = vst [vmem:[%s262_s17] sm:$0x3f] %v566_v63  ;;  %v568_v0 = vpop.f32.mrb[1].mxu1 }
 0x26e   : > { %574 = vst [vmem:[%s262_s17 + $0x8] sm:$0x3f] %v568_v0  ;;  %v570_v1 = vpop.f32.mrb[2].mxu1 }
 0x26f   : > { %v571_v3 = vpop.f32.mrb[3].mxu1 }
 0x270 PF: > { %s15_s20 = sadd.s32 1, %s743_s20   ;;  %s884_s18 = smov %s739_s19 }
 0x271   : > { %p12_p5 = scmp.ge.s32.totalorder %s15_s20, 4   ;;  %s885_s19 = smov %s887_s21 }
 0x273   :  { %14 = sbr.rel (!%p12_p5) target bundleno = 2 (0x2), region = 70 }

</bundles_post_ra>
